<compile_context>
chip_gen: v6e
topology: v6e:2x2x1
jax: 0.10.0
libtpu: 0.0.40
codegen_flags: <defaults>
</compile_context>

<pallas_src>
import jax
import jax.numpy as jnp
from jax.experimental import pallas as pl
from jax.experimental.pallas import tpu as pltpu

INIT_NORMAL_STD = 1e-4  # stand-in for config.init_normal_std


def _round_up(x, m):
    return ((x + m - 1) // m) * m


def _reduce_hidden_kernel(code_ref, ast_ref, wc_ref, wa_ref, b_ref, out_ref):
    # code_ref, ast_ref : [TB, H]  batch tiles (pipelined, double-buffered)
    # wc_ref, wa_ref    : [H, H]   weight halves W.T[:H], W.T[H:] (VMEM-resident)
    # b_ref             : [1, H]   f32 bias (VMEM-resident)
    # out_ref           : [TB, H]
    acc = jnp.dot(code_ref[...], wc_ref[...], preferred_element_type=jnp.float32)
    acc = acc + jnp.dot(ast_ref[...], wa_ref[...], preferred_element_type=jnp.float32)
    acc = acc + b_ref[...]                      # f32 bias, broadcast over rows
    out_ref[...] = jnp.maximum(acc, 0.0).astype(out_ref.dtype)


def prepare_reduce_hidden_params(weight, bias, param_dtype=None):
    """One-time parameter prep (NOT in the per-call hot path).

    weight : [H, 2H]  nn.Linear weight (PyTorch layout)
    bias   : [H]
    Returns (w_code_t [H,H], w_ast_t [H,H], bias2d [1,H] f32).
    Pass param_dtype=jnp.bfloat16 on v6e/v7x for the native MXU path and half
    the weight DMA/VMEM (accumulation stays f32 in the kernel).
    """
    h = weight.shape[0]
    assert weight.shape == (h, 2 * h)
    wt = weight.T                      # transpose once at init, never per call
    w_code_t = wt[:h, :]
    w_ast_t = wt[h:, :]
    if param_dtype is not None:
        w_code_t = w_code_t.astype(param_dtype)
        w_ast_t = w_ast_t.astype(param_dtype)
    bias2d = bias.astype(jnp.float32).reshape(1, h)   # keep bias add in f32
    return jnp.asarray(w_code_t), jnp.asarray(w_ast_t), bias2d


def reduce_hidden(code_hidden, ast_hidden, w_code_t, w_ast_t, bias2d, *, tb_max=512):
    """
    code_hidden, ast_hidden : [1, B, H]
    w_code_t, w_ast_t       : [H, H]   halves of W.T (from prepare_reduce_hidden_params)
    bias2d                  : [1, H]   f32
    returns                 : [1, B, H]
    """
    assert code_hidden.shape == ast_hidden.shape
    one, b, h = code_hidden.shape
    assert one == 1
    assert w_code_t.shape == (h, h) and w_ast_t.shape == (h, h)
    assert bias2d.shape == (1, h)

    code2d = code_hidden.reshape(b, h)
    ast2d = ast_hidden.reshape(b, h)

    act_bytes = code_hidden.dtype.itemsize
    w_bytes = (w_code_t.size * w_code_t.dtype.itemsize
               + w_ast_t.size * w_ast_t.dtype.itemsize)

    # Generation-aware VMEM capacity (v5e/v6e: 128 MiB, v7x: 64 MiB).
    try:
        vmem_cap = int(getattr(pltpu.get_tpu_info(), "vmem_capacity_bytes",
                               64 * 1024 * 1024))
    except Exception:
        vmem_cap = 64 * 1024 * 1024

    def est_vmem(t):
        # weights + bias single-buffered (Buffered(1)); code/ast/out tiles
        # double-buffered by the pipeline.
        return w_bytes + 4 * 128 * pl.cdiv(h, 128) + 2 * 3 * t * h * act_bytes

    # Batch tile: as large as reasonable (amortize ~0.35us/step, overlap DMA
    # with MXU), but at least 2 grid steps when B > 8 so v7x's 2 TensorCores
    # both get work; shrink if the footprint would not fit VMEM.
    if b <= 8:
        tb = b                                   # single full block (no (8,128) issue)
    else:
        tb = min(tb_max, max(8, _round_up(pl.cdiv(b, 2), 8)))
        while tb > 8 and est_vmem(tb) > vmem_cap - 8 * 1024 * 1024:
            tb = max(8, _round_up(tb // 2, 8))
    grid = (pl.cdiv(b, tb),)                     # ragged last block handled by Pallas

    # Always grant the estimated footprint (v5e scoped default is only ~16 MiB),
    # capped safely below physical VMEM (never exceeds v7x's 64 MiB).
    vmem_limit = min(max(32 * 1024 * 1024, int(est_vmem(tb) * 5 // 4)),
                     vmem_cap - 4 * 1024 * 1024)

    flops = 2 * b * (2 * h) * h + 2 * b * h      # matmuls + bias + relu
    bytes_accessed = 3 * b * h * act_bytes + w_bytes + h * 4

    out = pl.pallas_call(
        _reduce_hidden_kernel,
        out_shape=jax.ShapeDtypeStruct((b, h), code_hidden.dtype),
        grid_spec=pltpu.PrefetchScalarGridSpec(
            num_scalar_prefetch=0,
            grid=grid,
            in_specs=[
                pl.BlockSpec((tb, h), lambda i: (i, 0)),      # code tile (pipelined)
                pl.BlockSpec((tb, h), lambda i: (i, 0)),      # ast tile  (pipelined)
                pl.BlockSpec((h, h), lambda i: (0, 0),
                             pipeline_mode=pl.Buffered(1)),   # W.T[:H] resident
                pl.BlockSpec((h, h), lambda i: (0, 0),
                             pipeline_mode=pl.Buffered(1)),   # W.T[H:] resident
                pl.BlockSpec((1, h), lambda i: (0, 0),
                             pipeline_mode=pl.Buffered(1)),   # bias resident
            ],
            out_specs=pl.BlockSpec((tb, h), lambda i: (i, 0)),
        ),
        compiler_params=pltpu.CompilerParams(
            dimension_semantics=("parallel",),   # megacore / v7x 2-TC batch split
            vmem_limit_bytes=vmem_limit,
        ),
        cost_estimate=pl.CostEstimate(
            flops=flops, transcendentals=0, bytes_accessed=bytes_accessed),
    )(code2d, ast2d, w_code_t, w_ast_t, bias2d)

    return out.reshape(1, b, h)


if __name__ == "__main__":
    key = jax.random.PRNGKey(0)
    k1, k2, k3, k4, k5, k6 = jax.random.split(key, 6)

    B, H = 8, 32  # small shapes; the forward implies [1, B, H] activations

    # init_linear_wt: normal(std=config.init_normal_std) for weight & bias,
    # in the PyTorch nn.Linear layout [H, 2H].
    weight = INIT_NORMAL_STD * jax.random.normal(k1, (H, 2 * H), dtype=jnp.float32)
    bias = INIT_NORMAL_STD * jax.random.normal(k2, (H,), dtype=jnp.float32)

    # One-time param prep: transpose + split into two [H, H] halves, f32 bias.
    w_code_t, w_ast_t, bias2d = prepare_reduce_hidden_params(weight, bias)

    code_hidden = jax.random.normal(k3, (1, B, H), dtype=jnp.float32)
    ast_hidden = jax.random.normal(k4, (1, B, H), dtype=jnp.float32)

    out = reduce_hidden(code_hidden, ast_hidden, w_code_t, w_ast_t, bias2d)
    jax.block_until_ready(out)

    ref = jnp.maximum(
        jnp.concatenate([code_hidden, ast_hidden], axis=2) @ weight.T + bias, 0.0)
    assert out.shape == (1, B, H)
    assert jnp.allclose(out, ref, atol=5e-5, rtol=1e-2)

    # Multi-step grid + ragged last block (B % tb != 0), with NO wrapper-side
    # padding or output slicing.
    B2 = 20
    ch2 = jax.random.normal(k5, (1, B2, H), dtype=jnp.float32)
    ah2 = jax.random.normal(k6, (1, B2, H), dtype=jnp.float32)
    out2 = reduce_hidden(ch2, ah2, w_code_t, w_ast_t, bias2d, tb_max=8)
    jax.block_until_ready(out2)
    ref2 = jnp.maximum(
        jnp.concatenate([ch2, ah2], axis=2) @ weight.T + bias, 0.0)
    assert out2.shape == (1, B2, H)
    assert jnp.allclose(out2, ref2, atol=5e-5, rtol=1e-2)

    # bf16 weights + activations (native v6e/v7x MXU path), f32 accumulation.
    wc16, wa16, b16 = prepare_reduce_hidden_params(weight, bias,
                                                   param_dtype=jnp.bfloat16)
    ch3 = code_hidden.astype(jnp.bfloat16)
    ah3 = ast_hidden.astype(jnp.bfloat16)
    out3 = reduce_hidden(ch3, ah3, wc16, wa16, b16)
    jax.block_until_ready(out3)
    ref3 = jnp.maximum(
        jnp.concatenate([ch3.astype(jnp.float32), ah3.astype(jnp.float32)], axis=2)
        @ weight.T.astype(jnp.bfloat16).astype(jnp.float32) + bias, 0.0)
    assert out3.shape == (1, B, H)
    assert jnp.allclose(out3.astype(jnp.float32), ref3, atol=3e-4)

    print("KERNEL_OK")
</pallas_src>

<mosaic_0001>
module attributes {stable_mosaic.version = 11 : i64} {
  func.func @_reduce_hidden_kernel(%arg0: i32, %arg1: memref<8x32xf32, #tpu.memory_space<vmem>>, %arg2: memref<8x32xf32, #tpu.memory_space<vmem>>, %arg3: memref<32x32xf32, #tpu.memory_space<vmem>>, %arg4: memref<32x32xf32, #tpu.memory_space<vmem>>, %arg5: memref<1x32xf32, #tpu.memory_space<vmem>>, %arg6: memref<8x32xf32, #tpu.memory_space<vmem>>) attributes {dimension_semantics = [#tpu.dimension_semantics<parallel>], iteration_bounds = array<i64: 1>, scalar_prefetch = 0 : i64, scratch_operands = 0 : i64, tpu.core_type = #tpu.core_type<tc>, window_params = [{transform_indices = @transform_0, window_bounds = array<i64: 8, 32>}, {transform_indices = @transform_1, window_bounds = array<i64: 8, 32>}, {pipeline_mode = #tpu.pipeline_mode<synchronous>, transform_indices = @transform_2, window_bounds = array<i64: 32, 32>}, {pipeline_mode = #tpu.pipeline_mode<synchronous>, transform_indices = @transform_3, window_bounds = array<i64: 32, 32>}, {pipeline_mode = #tpu.pipeline_mode<synchronous>, transform_indices = @transform_4, window_bounds = array<i64: 1, 32>}, {transform_indices = @transform_5, window_bounds = array<i64: 8, 32>}]} {
    %c0 = arith.constant 0 : index
    %c0_0 = arith.constant 0 : index
    %0 = vector.load %arg1[%c0, %c0_0] : memref<8x32xf32, #tpu.memory_space<vmem>>, vector<8x32xf32>
    %c0_1 = arith.constant 0 : index
    %c0_2 = arith.constant 0 : index
    %1 = vector.load %arg3[%c0_1, %c0_2] : memref<32x32xf32, #tpu.memory_space<vmem>>, vector<32x32xf32>
    %cst = arith.constant dense<0.000000e+00> : vector<8x32xf32>
    %2 = tpu.matmul %0, %1, %cst {dimension_numbers = #tpu.dot_dimension_numbers<[1], [0], [0], [1], [0, 0, 1, 1], [], []>} : vector<8x32xf32>, vector<32x32xf32>, vector<8x32xf32> -> vector<8x32xf32>
    %c0_3 = arith.constant 0 : index
    %c0_4 = arith.constant 0 : index
    %3 = vector.load %arg2[%c0_3, %c0_4] : memref<8x32xf32, #tpu.memory_space<vmem>>, vector<8x32xf32>
    %c0_5 = arith.constant 0 : index
    %c0_6 = arith.constant 0 : index
    %4 = vector.load %arg4[%c0_5, %c0_6] : memref<32x32xf32, #tpu.memory_space<vmem>>, vector<32x32xf32>
    %cst_7 = arith.constant dense<0.000000e+00> : vector<8x32xf32>
    %5 = tpu.matmul %3, %4, %cst_7 {dimension_numbers = #tpu.dot_dimension_numbers<[1], [0], [0], [1], [0, 0, 1, 1], [], []>} : vector<8x32xf32>, vector<32x32xf32>, vector<8x32xf32> -> vector<8x32xf32>
    %6 = arith.addf %2, %5 : vector<8x32xf32>
    %c0_8 = arith.constant 0 : index
    %c0_9 = arith.constant 0 : index
    %7 = vector.load %arg5[%c0_8, %c0_9] : memref<1x32xf32, #tpu.memory_space<vmem>>, vector<1x32xf32>
    %8 = vector.broadcast %7 : vector<1x32xf32> to vector<8x32xf32>
    %9 = arith.addf %6, %8 : vector<8x32xf32>
    %cst_10 = arith.constant 0.000000e+00 : f32
    %10 = vector.broadcast %cst_10 : f32 to vector<8x32xf32>
    %11 = arith.maximumf %9, %10 : vector<8x32xf32>
    %c0_11 = arith.constant 0 : index
    %c0_12 = arith.constant 0 : index
    %12 = vector.load %arg6[%c0_11, %c0_12] : memref<8x32xf32, #tpu.memory_space<vmem>>, vector<8x32xf32>
    tpu.vector_store %arg6[%c0_11, %c0_12], %11 {strides = array<i32>} : memref<8x32xf32, #tpu.memory_space<vmem>>, vector<8x32xf32>,
    return
  }
  func.func @transform_0(%arg0: i32) -> (i32, i32) {
    %c0_i32 = arith.constant 0 : i32
    %c0_i32_0 = arith.constant 0 : i32
    return %arg0, %c0_i32 : i32, i32
  }
  func.func @transform_1(%arg0: i32) -> (i32, i32) {
    %c0_i32 = arith.constant 0 : i32
    %c0_i32_0 = arith.constant 0 : i32
    return %arg0, %c0_i32 : i32, i32
  }
  func.func @transform_2(%arg0: i32) -> (i32, i32) {
    %c0_i32 = arith.constant 0 : i32
    %c0_i32_0 = arith.constant 0 : i32
    %c0_i32_1 = arith.constant 0 : i32
    return %c0_i32, %c0_i32_0 : i32, i32
  }
  func.func @transform_3(%arg0: i32) -> (i32, i32) {
    %c0_i32 = arith.constant 0 : i32
    %c0_i32_0 = arith.constant 0 : i32
    %c0_i32_1 = arith.constant 0 : i32
    return %c0_i32, %c0_i32_0 : i32, i32
  }
  func.func @transform_4(%arg0: i32) -> (i32, i32) {
    %c0_i32 = arith.constant 0 : i32
    %c0_i32_0 = arith.constant 0 : i32
    %c0_i32_1 = arith.constant 0 : i32
    return %c0_i32, %c0_i32_0 : i32, i32
  }
  func.func @transform_5(%arg0: i32) -> (i32, i32) {
    %c0_i32 = arith.constant 0 : i32
    %c0_i32_0 = arith.constant 0 : i32
    return %arg0, %c0_i32 : i32, i32
  }
}

</mosaic_0001>

<bundles_post_ra>
// kernel: tpu_custom_call.1
= control target key start
LH: loop header
LB: loop body
LE: loop exit
PB: predicated region body
PF: predicated region fallthrough
CT: control target
= control target key end

     0   :  { %10 = vsyncpa [#allocation3], 0  ;;  %s468_s0 = inlined_call_operand.hbm [shape: f32[8,32], index: 0, kind: input, shape index: {}]   ;;  %s469_s1 = inlined_call_operand.hbm [shape: f32[8,32], index: 1, kind: input, shape index: {}]   ;;  %s470_s2 = inlined_call_operand.hbm [shape: f32[32,32], index: 2, kind: input, shape index: {}]   ;;  %s471_s3 = inlined_call_operand.hbm [shape: f32[32,32], index: 3, kind: input, shape index: {}]   ;;  %s472_s4 = inlined_call_operand.vmem [shape: f32[1,32], index: 4, kind: input, shape index: {}]   ;;  %s473_s5 = inlined_call_operand.hbm [shape: f32[8,32], index: 5, kind: output, shape index: {}]  }
   0x1   :  { %11 = vsyncpa [#allocation6], 0 }
   0x2   :  { %12 = vsyncpa [#allocation9], 0 }
   0x3   :  { %13 = vsyncpa [#allocation4], 0  ;;  %s408_s18 = smov [#allocation5]   ;;  %s409_s20 = smov [#allocation2]  }
   0x4   :  { %s30_s19 = sshll.u32 %s408_s18, 4  ;;  %s20_s21 = sshll.u32 %s409_s20, 4  ;;  %s31_s19 = int_to_ptr.vmem [resolvable:$true] %s30_s19  ;;  %s21_s21 = int_to_ptr.vmem [resolvable:$true] %s20_s21 }
   0x5   :  { %s308_s22 = scalar_lea.vmem %s31_s19, 128  ;;  %p313_p1 = scmp.lt.s32.totalorder %s31_s19, %s31_s19 }
   0x6   :  { %p309_p0 = scmp.ne.s32.totalorder %s31_s19, %s308_s22  ;;  %p314_p2 = scmp.lt.s32.totalorder %s308_s22, %s308_s22 }
   0x8   :  { %p315_p3 = por %p314_p2, %p313_p1 }
   0xa   :  { %p316_p4 = pnand %p315_p3, %p309_p0 }
   0xc   :  { %319 = shalt.err (!%p316_p4)
}
   0xd   :  { %33 = dma.hbm_to_vmem [thread:$0]  %s469_s1, 128, %s31_s19, [#allocation6]  }
   0xe   :  { %s328_s25 = scalar_lea.vmem %s21_s21, 128  ;;  %p333_p6 = scmp.lt.s32.totalorder %s21_s21, %s21_s21 }
   0xf   :  { %p329_p5 = scmp.ne.s32.totalorder %s21_s21, %s328_s25  ;;  %p334_p7 = scmp.lt.s32.totalorder %s328_s25, %s328_s25 }
  0x11   :  { %p335_p8 = por %p334_p7, %p333_p6 }
  0x13   :  { %p336_p9 = pnand %p335_p8, %p329_p5 }
  0x15   :  { %339 = shalt.err (!%p336_p9)
}
  0x16   :  { %23 = dma.hbm_to_vmem [thread:$0]  %s468_s0, 128, %s21_s21, [#allocation3]  }
  0x17   :  { %s410_s28 = smov [#allocation7]  }
  0x18   :  { %s39_s29 = sshll.u32 %s410_s28, 4  ;;  %s40_s29 = int_to_ptr.vmem [resolvable:$true] %s39_s29 }
  0x19   :  { %s348_s30 = scalar_lea.vmem %s40_s29, 512  ;;  %p353_p11 = scmp.lt.s32.totalorder %s40_s29, %s40_s29 }
  0x1a   :  { %p349_p10 = scmp.ne.s32.totalorder %s40_s29, %s348_s30  ;;  %p354_p12 = scmp.lt.s32.totalorder %s348_s30, %s348_s30 }
  0x1c   :  { %p355_p13 = por %p354_p12, %p353_p11 }
  0x1e   :  { %p356_p0 = pnand %p355_p13, %p349_p10 }
  0x20   :  { %359 = shalt.err (!%p356_p0)
}
  0x21   :  { %s411_s1 = smov 128   ;;  %s412_s6 = smov 8  }
  0x22   :  { %45 = dma.hbm_to_vmem [thread:$0]  %s470_s2, 512, %s40_s29, [#allocation6], %s411_s1, %s411_s1, %s412_s6  }
  0x23   :  { %s413_s9 = smov [#allocation8]  }
  0x24   :  { %s51_s10 = sshll.u32 %s413_s9, 4  ;;  %s52_s10 = int_to_ptr.vmem [resolvable:$true] %s51_s10 }
  0x25   :  { %s368_s0 = scalar_lea.vmem %s52_s10, 512  ;;  %p373_p2 = scmp.lt.s32.totalorder %s52_s10, %s52_s10 }
  0x26   :  { %p369_p1 = scmp.ne.s32.totalorder %s52_s10, %s368_s0  ;;  %p374_p3 = scmp.lt.s32.totalorder %s368_s0, %s368_s0 }
  0x28   :  { %p375_p4 = por %p374_p3, %p373_p2 }
  0x2a   :  { %p376_p5 = pnand %p375_p4, %p369_p1 }
  0x2c   :  { %379 = shalt.err (!%p376_p5)
}
  0x2d   :  { %57 = dma.hbm_to_vmem [thread:$0]  %s471_s3, 512, %s52_s10, [#allocation9], %s411_s1, %s411_s1, %s412_s6  }
  0x2e   :  { %400 = dma.done.wait [#allocation3], 128  }
  0x2f   :  { %401 = vsyncadd [#allocation3], 4294967168 }
  0x30   :  { %402 = dma.done.wait [#allocation6], 640  }
  0x31   :  { %403 = vsyncadd [#allocation6], 4294966656 }
  0x32   :  { %404 = dma.done.wait [#allocation9], 512  }
  0x33   :  { %405 = vsyncadd [#allocation9], 4294966784  ;;  %v414_v0 = vmov 0.0   ;;  %vm415_vm0 = vmmov 0   ;;  %v81_v1 = vld [vmem:[#allocation8 + $0x18] sm:$0xff]  ;;  %v80_v3 = vld [vmem:[#allocation8 + $0x10] sm:$0xff] }
  0x34   :  { %269 = vmatprep.subr.mxu0 %v414_v0  ;;  %280 = vmatprep.subr.mxu1 %v414_v0  ;;  %v76_v2 = vld [vmem:[#allocation7 + $0x18] sm:$0xff]  ;;  %v75_v4 = vld [vmem:[#allocation7 + $0x10] sm:$0xff]  ;;  %v79_v5 = vld [vmem:[#allocation8 + $0x8] sm:$0xff]  ;;  %vm82_vm1 = vcmask 261120   ;;  %s416_s13 = smov [#allocation10]  }
  0x35   :  { %277 = vmatprep.mubr.msk.f32.mxu0 %vm415_vm0, %v414_v0  ;;  %288 = vmatprep.mubr.msk.f32.mxu1 %vm415_vm0, %v414_v0  ;;  %v74_v6 = vld [vmem:[#allocation7 + $0x8] sm:$0xff]  ;;  %v78_v7 = vld [vmem:[#allocation8] sm:$0xff]  ;;  %v77_v9 = vld [vmem:[#allocation5] sm:$0xff]  ;;  %s245_s14 = sshll.u32 %s416_s13, 4  ;;  %s246_s14 = int_to_ptr.vmem [resolvable:$true] %s245_s14 }
  0x36   :  { %270 = vmatpush3.msra.mxu0 %v81_v1  ;;  %281 = vmatpush3.msra.mxu1 %v76_v2  ;;  %v73_v8 = vld [vmem:[#allocation7] sm:$0xff]  ;;  %v72_v10 = vld [vmem:[#allocation2] sm:$0xff]  ;;  %s380_s15 = scalar_lea.vmem %s246_s14, 128  ;;  %p385_p7 = scmp.lt.s32.totalorder %s246_s14, %s246_s14 }
  0x37   :  { %271 = vmatprep.subr.mxu0 %v414_v0  ;;  %282 = vmatprep.subr.mxu1 %v414_v0  ;;  %v258_v13 = vld [vmem:[%s472_s4] ss:$0 sm:$0xff]  ;;  %p381_p6 = scmp.ne.s32.totalorder %s246_s14, %s380_s15  ;;  %p386_p8 = scmp.lt.s32.totalorder %s380_s15, %s380_s15 }
  0x38   :  { %272 = vmatpush3.msra.mxu0 %v80_v3  ;;  %283 = vmatpush3.msra.mxu1 %v75_v4 }
  0x39   :  { %273 = vmatprep.subr.mxu0 %v414_v0  ;;  %284 = vmatprep.subr.mxu1 %v414_v0  ;;  %p387_p9 = por %p386_p8, %p385_p7 }
  0x3a   :  { %274 = vmatpush3.msra.mxu0 %v79_v5  ;;  %285 = vmatpush3.msra.mxu1 %v74_v6 }
  0x3b   :  { %275 = vmatprep.subr.mxu0 %v414_v0  ;;  %286 = vmatprep.subr.mxu1 %v414_v0  ;;  %p388_p10 = pnand %p387_p9, %p381_p6 }
  0x3c   :  { %276 = vmatpush3.msra.mxu0 %v78_v7  ;;  %287 = vmatpush3.msra.mxu1 %v73_v8 }
  0x3d   :  { %278 = vmatmul.mubr.msk.f32.vlgmr.msra.gmra.mxu0 %vm82_vm1, %v77_v9  ;;  %289 = vmatmul.mubr.msk.f32.vlgmr.msra.gmra.mxu1 %vm82_vm1, %v72_v10 }
  0xfd   :  { %v152_v11 = vpop.f32.mrf.mxu0  ;;  %v225_v12 = vpop.f32.mrf.mxu1 }
  0xfe   :  { %v226_v14 = vadd.f32 %v225_v12, %v152_v11 }
  0xff   :  { %v279_v15 = vpop.f32.mrf.mxu0  ;;  %v290_v16 = vpop.f32.mrf.mxu1 }
 0x100   :  { %v236_v17 = vadd.f32 %v258_v13, %v226_v14 }
 0x102   :  { %v237_v18 = vmax.f32 %v236_v17, 0.0 }
 0x104   :  { %238 = vst.msk [vmem:[#allocation10] sm:$0xff] %vm82_vm1, %v237_v18 }
 0x105   :  { %391 = shalt.err (!%p388_p10)
}
 0x106   :  { %248 = dma.vmem_to_hbm [thread:$0]  %s246_s14, 128, %s473_s5, [#allocation4]  }
 0x107   :  { %406 = dma.done.wait [#allocation4], 128  }
 0x108   :  { %407 = vsyncadd [#allocation4], 4294967168 }
 0x109   :  { %252 = vsyncpa [#allocation3], 1 }
 0x10a   :  { %253 = vsyncpa [#allocation6], 1 }
 0x10b   :  { %254 = vsyncpa [#allocation9], 1 }
 0x10c   :  { %255 = vsyncpa [#allocation4], 1 }

</bundles_post_ra>
